<compile_context>
chip_gen: v5e
topology: v5e:2x2
jax: 0.10.0
libtpu: 0.0.40
codegen_flags: <defaults>
</compile_context>

<pallas_src>
import functools

import jax
import jax.numpy as jnp
from jax import lax
from jax.experimental import pallas as pl
from jax.experimental.pallas import tpu as pltpu


_LANE = 128
_BLOCK_BUDGET = 2 << 20     # ~2 MiB (f32) per streamed block
_FUSED_BUDGET = 2 << 20     # use the fused single-kernel path when f32(h) fits this
_VMEM_LIMIT = 32 << 20      # raise v5e's 16 MiB scoped default; safe on v6e/v7x


def _cdiv(a, b):
    return (a + b - 1) // b


def _pick_tiles(rows, hw, block_bytes):
    """Row (sublane) / HW (lane) tile sizes for the tiled two-pass path."""
    # Lane tile: whole spatial row if it fits the budget at 8 rows (then there
    # are no partial lane blocks at all), otherwise a multiple of 128 with a
    # masked tail block.
    hw_cap = max(_LANE, (block_bytes // (8 * 4)) // _LANE * _LANE)
    hw_t = hw if hw <= hw_cap else hw_cap

    if rows % 8 == 0:
        # Row tile: multiple of 8 that divides rows and fills the block budget.
        row_t = max(8, min(rows, (block_bytes // (hw_t * 4)) // 8 * 8))
        if rows >= 16:                      # keep >=2 row tiles (megacore / pipelining)
            row_t = min(row_t, rows // 2)
        row_t = max(8, row_t // 8 * 8)
        while rows % row_t:
            row_t -= 8
    else:
        # Rare (N*C not a multiple of 8): take all rows in one tile; shrink the
        # lane tile if that would blow the block budget.
        row_t = rows
        if rows * hw_t * 4 > 2 * block_bytes and hw_t > _LANE:
            hw_t = max(_LANE, (2 * block_bytes // (rows * 4)) // _LANE * _LANE)
    return row_t, hw_t


# --------------------------------------------------------------------------
# Kernels
# --------------------------------------------------------------------------
def _make_fused_kernel(n, hw, eps):
    """Single-kernel path: h resident in VMEM; centered (exact) variance."""
    inv_cnt = 1.0 / float(n * hw)

    def kernel(h_ref, gb_ref, o_ref):
        h = h_ref[...].astype(jnp.float32)                     # (N, C, HW)
        s = jnp.sum(h, axis=2, keepdims=True)                  # (N, C, 1)
        mean = jnp.sum(s, axis=0, keepdims=True) * inv_cnt     # (1, C, 1)
        cen = h - mean
        ss = jnp.sum(cen * cen, axis=2, keepdims=True)         # (N, C, 1)
        var = jnp.sum(ss, axis=0, keepdims=True) * inv_cnt     # (1, C, 1)
        inv_std = lax.rsqrt(var + eps)
        gamma = gb_ref[:, :, 0:1].astype(jnp.float32)          # (N, C, 1)
        beta = gb_ref[:, :, 1:2].astype(jnp.float32)           # (N, C, 1)
        o_ref[...] = (gamma * (cen * inv_std) + beta).astype(o_ref.dtype)

    return kernel


def _make_reduce_kernel(hw, hw_t):
    """Pass 1: per-row partial sum / sum-of-squares accumulated over HW tiles."""
    need_mask = (hw % hw_t) != 0

    def kernel(h_ref, sum_ref, sumsq_ref):
        h = h_ref[...].astype(jnp.float32)                     # (row_t, hw_t)
        if need_mask:
            lane = lax.broadcasted_iota(jnp.int32, h.shape, 1)
            valid = (pl.program_id(1) * hw_t + lane) < hw
            h = jnp.where(valid, h, 0.0)
        s = jnp.sum(h, axis=-1, keepdims=True)                 # (row_t, 1)
        ss = jnp.sum(h * h, axis=-1, keepdims=True)            # (row_t, 1)

        @pl.when(pl.program_id(1) == 0)
        def _():
            sum_ref[...] = s
            sumsq_ref[...] = ss

        @pl.when(pl.program_id(1) != 0)
        def _():
            sum_ref[...] = sum_ref[...] + s
            sumsq_ref[...] = sumsq_ref[...] + ss

    return kernel


def _apply_kernel(h_ref, ab_ref, o_ref):
    """Pass 2: out = a[row] * h + b[row]  (pure elementwise FMA)."""
    h = h_ref[...].astype(jnp.float32)                         # (row_t, hw_t)
    a = ab_ref[:, 0:1]                                         # (row_t, 1)
    b = ab_ref[:, 1:2]                                         # (row_t, 1)
    o_ref[...] = (a * h + b).astype(o_ref.dtype)


# --------------------------------------------------------------------------
# Wrapper
# --------------------------------------------------------------------------
@functools.partial(jax.jit, static_argnames=("eps", "force_tiled", "block_bytes"))
def self_modulated_batchnorm2d(h, z, gamma_w, gamma_b, beta_w, beta_b,
                               eps=1e-5, force_tiled=False,
                               block_bytes=_BLOCK_BUDGET):
    """h: [N, C, H, W] (NCHW), z: [N, L].
    gamma_w/beta_w: [L, C] (transposed from PyTorch nn.Linear's [C, L]),
    gamma_b/beta_b: [C]."""
    N, C, H, W = h.shape
    HW = H * W
    rows = N * C

    # gamma/beta Linear hoisted out of the kernels: one fused tiny matmul.
    w_cat = jnp.concatenate([gamma_w, beta_w], axis=1).astype(jnp.float32)  # [L, 2C]
    b_cat = jnp.concatenate([gamma_b, beta_b]).astype(jnp.float32)          # [2C]
    gb = z.astype(jnp.float32) @ w_cat + b_cat                              # [N, 2C]
    gamma, beta = gb[:, :C], gb[:, C:]

    h3 = h.reshape(N, C, HW)   # free reshape; HW on the lane (fast) axis

    # ---- Fused single-kernel path: h is VMEM-resident (1 read + 1 write) ----
    if (not force_tiled) and rows * HW * 4 <= _FUSED_BUDGET:
        gb_pack = jnp.stack([gamma, beta], axis=-1)            # (N, C, 2)
        out3 = pl.pallas_call(
            _make_fused_kernel(N, HW, eps),
            out_shape=jax.ShapeDtypeStruct((N, C, HW), h.dtype),
            compiler_params=pltpu.CompilerParams(vmem_limit_bytes=_VMEM_LIMIT),
        )(h3, gb_pack)
        return out3.reshape(N, C, H, W)

    # ---- Tiled two-pass path ----
    h2 = h3.reshape(rows, HW)
    row_t, hw_t = _pick_tiles(rows, HW, block_bytes)
    R = _cdiv(rows, row_t)            # exact by construction of row_t
    K = _cdiv(HW, hw_t)               # last HW tile may be ragged (masked)

    # Pass 1: per-row sum / sum-of-squares in a single sweep of h.
    sums, sumsqs = pl.pallas_call(
        _make_reduce_kernel(HW, hw_t),
        grid=(R, K),
        in_specs=[pl.BlockSpec((row_t, hw_t), lambda r, k: (r, k))],
        out_specs=[pl.BlockSpec((row_t, 1), lambda r, k: (r, 0)),
                   pl.BlockSpec((row_t, 1), lambda r, k: (r, 0))],
        out_shape=[jax.ShapeDtypeStruct((rows, 1), jnp.float32),
                   jax.ShapeDtypeStruct((rows, 1), jnp.float32)],
        compiler_params=pltpu.CompilerParams(
            dimension_semantics=("parallel", "arbitrary"),
            vmem_limit_bytes=_VMEM_LIMIT),
    )(h2)

    # Tiny per-channel / per-(n, c) math in plain JAX (negligible).
    count = jnp.float32(N * HW)
    mean = jnp.sum(sums.reshape(N, C), axis=0) / count          # [C]
    ex2 = jnp.sum(sumsqs.reshape(N, C), axis=0) / count         # [C]
    var = jnp.maximum(ex2 - mean * mean, 0.0)                   # biased variance
    inv_std = lax.rsqrt(var + eps)                              # [C]

    # Fold BN normalization + modulation into one per-(n, c) scale/shift.
    a = gamma * inv_std[None, :]                                # [N, C]
    b = beta - gamma * (inv_std * mean)[None, :]                # [N, C]
    ab = jnp.stack([a, b], axis=-1).reshape(rows, 2)            # packed operand

    # Pass 2: tiled elementwise apply (lane-dense blocks, both axes parallel).
    out2 = pl.pallas_call(
        _apply_kernel,
        grid=(R, K),
        in_specs=[pl.BlockSpec((row_t, hw_t), lambda r, k: (r, k)),
                  pl.BlockSpec((row_t, 2), lambda r, k: (r, 0))],
        out_specs=pl.BlockSpec((row_t, hw_t), lambda r, k: (r, k)),
        out_shape=jax.ShapeDtypeStruct((rows, HW), h.dtype),
        compiler_params=pltpu.CompilerParams(
            dimension_semantics=("parallel", "parallel"),
            vmem_limit_bytes=_VMEM_LIMIT),
    )(h2, ab)

    return out2.reshape(N, C, H, W)


# --------------------------------------------------------------------------
# Reference + tests
# --------------------------------------------------------------------------
def _reference(h, z, gamma_w, gamma_b, beta_w, beta_b, eps=1e-5):
    mean = jnp.mean(h, axis=(0, 2, 3), keepdims=True)
    var = jnp.mean((h - mean) ** 2, axis=(0, 2, 3), keepdims=True)
    xhat = (h - mean) / jnp.sqrt(var + eps)
    gamma = z @ gamma_w + gamma_b           # [N, C]
    beta = z @ beta_w + beta_b              # [N, C]
    return gamma[:, :, None, None] * xhat + beta[:, :, None, None]


def _run_case(key, N, C, H, W, L, **kw):
    k_h, k_z, k_wg, k_bg, k_wb, k_bb = jax.random.split(key, 6)
    h = jax.random.normal(k_h, (N, C, H, W), dtype=jnp.float32)
    z = jax.random.normal(k_z, (N, L), dtype=jnp.float32)
    # nn.Linear(num_latent, num_features) x2, stored as [L, C] for z @ W.
    gamma_w = 0.1 * jax.random.normal(k_wg, (L, C), dtype=jnp.float32)
    gamma_b = 0.1 * jax.random.normal(k_bg, (C,), dtype=jnp.float32)
    beta_w = 0.1 * jax.random.normal(k_wb, (L, C), dtype=jnp.float32)
    beta_b = 0.1 * jax.random.normal(k_bb, (C,), dtype=jnp.float32)

    out = jax.block_until_ready(
        self_modulated_batchnorm2d(h, z, gamma_w, gamma_b, beta_w, beta_b, **kw))
    ref = _reference(h, z, gamma_w, gamma_b, beta_w, beta_b)
    assert out.shape == (N, C, H, W)
    err = float(jnp.max(jnp.abs(out - ref)))
    assert err < 2e-4, f"case ({N},{C},{H},{W}) max abs err {err}"


if __name__ == "__main__":
    key = jax.random.PRNGKey(0)
    keys = jax.random.split(key, 4)

    # A: module-default small shape -> fused single-kernel (VMEM-resident) path.
    _run_case(keys[0], 2, 4, 16, 16, 8)
    # B: tiled two-pass path, aligned rows/lanes (forced past the fused gate).
    _run_case(keys[1], 2, 16, 32, 32, 8, force_tiled=True)
    # C: tiled path, spatial size not a multiple of 128 (whole-row lane tile).
    _run_case(keys[2], 1, 8, 10, 10, 8, force_tiled=True)
    # D: tiled path with a ragged (masked) tail lane tile: HW=144, hw_t=128.
    _run_case(keys[3], 1, 8, 12, 12, 8, force_tiled=True, block_bytes=4096)

    print("KERNEL_OK")
</pallas_src>

<mosaic_0001>
module attributes {stable_mosaic.version = 11 : i64} {
  func.func @kernel(%arg0: memref<2x4x256xf32, #tpu.memory_space<vmem>>, %arg1: memref<2x4x2xf32, #tpu.memory_space<vmem>>, %arg2: memref<2x4x256xf32, #tpu.memory_space<vmem>>) attributes {dimension_semantics = [], scalar_prefetch = 0 : i64, scratch_operands = 0 : i64, tpu.core_type = #tpu.core_type<tc>} {
    %c0 = arith.constant 0 : index
    %c0_0 = arith.constant 0 : index
    %c0_1 = arith.constant 0 : index
    %0 = vector.load %arg0[%c0, %c0_0, %c0_1] : memref<2x4x256xf32, #tpu.memory_space<vmem>>, vector<2x4x256xf32>
    %cst = arith.constant dense<0.000000e+00> : vector<2x4xf32>
    %1 = vector.multi_reduction <add>, %0, %cst [2] : vector<2x4x256xf32> to vector<2x4xf32>
    %2 = vector.shape_cast %1 : vector<2x4xf32> to vector<2x4x1xf32>
    %cst_2 = arith.constant dense<0.000000e+00> : vector<4x1xf32>
    %3 = vector.multi_reduction <add>, %2, %cst_2 [0] : vector<2x4x1xf32> to vector<4x1xf32>
    %4 = vector.shape_cast %3 : vector<4x1xf32> to vector<1x4x1xf32>
    %cst_3 = arith.constant 0.001953125 : f32
    %5 = vector.broadcast %cst_3 : f32 to vector<1x4x1xf32>
    %6 = arith.mulf %4, %5 : vector<1x4x1xf32>
    %7 = vector.broadcast %6 : vector<1x4x1xf32> to vector<2x4x256xf32>
    %8 = arith.subf %0, %7 : vector<2x4x256xf32>
    %9 = arith.mulf %8, %8 : vector<2x4x256xf32>
    %cst_4 = arith.constant dense<0.000000e+00> : vector<2x4xf32>
    %10 = vector.multi_reduction <add>, %9, %cst_4 [2] : vector<2x4x256xf32> to vector<2x4xf32>
    %11 = vector.shape_cast %10 : vector<2x4xf32> to vector<2x4x1xf32>
    %cst_5 = arith.constant dense<0.000000e+00> : vector<4x1xf32>
    %12 = vector.multi_reduction <add>, %11, %cst_5 [0] : vector<2x4x1xf32> to vector<4x1xf32>
    %13 = vector.shape_cast %12 : vector<4x1xf32> to vector<1x4x1xf32>
    %cst_6 = arith.constant 0.001953125 : f32
    %14 = vector.broadcast %cst_6 : f32 to vector<1x4x1xf32>
    %15 = arith.mulf %13, %14 : vector<1x4x1xf32>
    %cst_7 = arith.constant 9.99999974E-6 : f32
    %16 = vector.broadcast %cst_7 : f32 to vector<1x4x1xf32>
    %17 = arith.addf %15, %16 : vector<1x4x1xf32>
    %18 = math.rsqrt %17 : vector<1x4x1xf32>
    %c0_8 = arith.constant 0 : index
    %c0_9 = arith.constant 0 : index
    %c0_10 = arith.constant 0 : index
    %19 = vector.load %arg1[%c0_8, %c0_9, %c0_10] : memref<2x4x2xf32, #tpu.memory_space<vmem>>, vector<2x4x1xf32>
    %c0_11 = arith.constant 0 : index
    %c0_12 = arith.constant 0 : index
    %c1 = arith.constant 1 : index
    %20 = vector.load %arg1[%c0_11, %c0_12, %c1] : memref<2x4x2xf32, #tpu.memory_space<vmem>>, vector<2x4x1xf32>
    %21 = vector.broadcast %18 : vector<1x4x1xf32> to vector<2x4x256xf32>
    %22 = arith.mulf %8, %21 : vector<2x4x256xf32>
    %23 = vector.broadcast %19 : vector<2x4x1xf32> to vector<2x4x256xf32>
    %24 = arith.mulf %23, %22 : vector<2x4x256xf32>
    %25 = vector.broadcast %20 : vector<2x4x1xf32> to vector<2x4x256xf32>
    %26 = arith.addf %24, %25 : vector<2x4x256xf32>
    %c0_13 = arith.constant 0 : index
    %c0_14 = arith.constant 0 : index
    %c0_15 = arith.constant 0 : index
    %27 = vector.load %arg2[%c0_13, %c0_14, %c0_15] : memref<2x4x256xf32, #tpu.memory_space<vmem>>, vector<2x4x256xf32>
    tpu.vector_store %arg2[%c0_13, %c0_14, %c0_15], %26 {strides = array<i32>} : memref<2x4x256xf32, #tpu.memory_space<vmem>>, vector<2x4x256xf32>,
    return
  }
}

</mosaic_0001>

<bundles_post_ra>
// kernel: self_modulated_batchnorm2d.1
= control target key start
LH: loop header
LB: loop body
LE: loop exit
PB: predicated region body
PF: predicated region fallthrough
CT: control target
= control target key end

     0   :  { %vm26_vm0 = vcmask 1043456   ;;  %v162_v13 = vmov 839922192   ;;  %v163_v17 = vmov 1   ;;  %v164_v35 = vmov 0   ;;  %s212_s0 = inlined_call_operand.vmem [shape: f32[2,4,256], index: 0, kind: input, shape index: {}]   ;;  %s213_s1 = inlined_call_operand.vmem [shape: f32[2,4,2], index: 1, kind: input, shape index: {}]   ;;  %s214_s2 = inlined_call_operand.vmem [shape: f32[2,4,256], index: 2, kind: output, shape index: {}]  }
   0x1   :  { %v11_v0 = vld [vmem:[%s212_s0] sm:$0xff]  ;;  %v12_v1 = vld [vmem:[%s212_s0 + $0x8] sm:$0xff]  ;;  %v43_v14 = vunpack.c.l.s4 %v162_v13  ;;  %159 = vset.pattern.permute.xlu1 %v163_v17  ;;  %158 = vset.pattern.permute.xlu0 %v163_v17 }
   0x2   :  { %15 = vst [vmem:[#allocation1] ss:$2 sm:$0xff] %v11_v0  ;;  %v89_v15 = vld [vmem:[%s213_s1] sm:$0xf]  ;;  %157 = vset.pattern.permute.xlu2 %v164_v35  ;;  %v90_v39 = vld [vmem:[%s213_s1 + $0x4] sm:$0xf] }
   0x3   :  { %19 = vst [vmem:[#allocation1 + $0x10] ss:$2 sm:$0xff] %v12_v1  ;;  %v44_v20 = vunpack.c.0.s8 %v43_v14  ;;  %101 = vperm.xlu2 %157, %v89_v15  }
   0x9   :  { %v16_v2 = vld.sshfl [vmem:[#allocation1] sm:$0xff pattern:$0x75316420]  ;;  %v17_v3 = vld.sshfl [vmem:[#allocation1 + $0x8] sm:$0xff pattern:$0x75316420] }
   0xa   :  { %v27_v4 = vsel %vm26_vm0, %v16_v2, 0.0  ;;  %v28_v5 = vsel %vm26_vm0, %v17_v3, 0.0  ;;  %v20_v7 = vld.sshfl [vmem:[#allocation1 + $0x10] sm:$0xff pattern:$0x75316420] }
   0xb   :  { %v29_v6 = vadd.f32 %v28_v5, %v27_v4  ;;  %v21_v8 = vld.sshfl [vmem:[#allocation1 + $0x18] sm:$0xff pattern:$0x75316420]  ;;  %v32_v9 = vsel %vm26_vm0, %v20_v7, 0.0  ;;  %106 = vperm.xlu2 %157, %v90_v39  }
   0xc   :  { %v33_v10 = vsel %vm26_vm0, %v21_v8, 0.0 }
   0xd   :  { %30 = vadd.xlane.f32.xlu0 %v29_v6  ;;  %v34_v11 = vadd.f32 %v33_v10, %v32_v9 }
  0x15   :  { %35 = vadd.xlane.f32.xlu0 %v34_v11 }
  0x29   :  { %127 = vperm.xlu0 %158, %v89_v15  }
  0x5d   :  { %v102_v57 = vpop.permute.xlu2 %101 }
  0x65   :  { %v107_v63 = vpop.permute.xlu2 %106 }
  0x80   :  { %v31_v12 = vpop.xlane.xlu0 %30 }
  0x81   :  { %v37_v18 = vsel %vm26_vm0, %v31_v12, 0.0 }
  0x88   :  { %v36_v16 = vpop.xlane.xlu0 %35 }
  0x89   :  { %v38_v19 = vsel %vm26_vm0, %v36_v16, 0.0 }
  0x8a   :  { %v39_v21 = vadd.f32 %v38_v19, %v37_v18 }
  0x8c   :  { %v40_v22 = vmul.f32 0.001953125, %v39_v21 }
  0x8e   :  { %v45_v23 = vperm.slane %v40_v22, %v44_v20 }
  0x90   :  { %v47_v24 = vsub.f32 %v11_v0, %v45_v23  ;;  %v48_v25 = vsub.f32 %v12_v1, %v45_v23 }
  0x92   :  { %v49_v26 = vmul.f32 %v47_v24, %v47_v24  ;;  %v50_v27 = vmul.f32 %v48_v25, %v48_v25 }
  0x94   :  { %53 = vst [vmem:[#allocation1] ss:$2 sm:$0xff] %v49_v26 }
  0x95   :  { %57 = vst [vmem:[#allocation1 + $0x10] ss:$2 sm:$0xff] %v50_v27 }
  0x9b   :  { %v54_v28 = vld.sshfl [vmem:[#allocation1] sm:$0xff pattern:$0x75316420]  ;;  %v55_v29 = vld.sshfl [vmem:[#allocation1 + $0x8] sm:$0xff pattern:$0x75316420]  ;;  %v128_v60 = vpop.permute.xlu0 %127 }
  0x9c   :  { %v64_v30 = vsel %vm26_vm0, %v54_v28, 0.0  ;;  %v65_v31 = vsel %vm26_vm0, %v55_v29, 0.0  ;;  %v58_v33 = vld.sshfl [vmem:[#allocation1 + $0x10] sm:$0xff pattern:$0x75316420] }
  0x9d   :  { %v66_v32 = vadd.f32 %v65_v31, %v64_v30  ;;  %v59_v34 = vld.sshfl [vmem:[#allocation1 + $0x18] sm:$0xff pattern:$0x75316420]  ;;  %v69_v36 = vsel %vm26_vm0, %v58_v33, 0.0 }
  0x9e   :  { %v70_v37 = vsel %vm26_vm0, %v59_v34, 0.0 }
  0x9f   :  { %67 = vadd.xlane.f32.xlu1 %v66_v32  ;;  %v71_v38 = vadd.f32 %v70_v37, %v69_v36 }
  0xa7   :  { %72 = vadd.xlane.f32.xlu1 %v71_v38 }
  0xc0   :  { %131 = vperm.xlu1 %159, %v90_v39  }
 0x112   :  { %v68_v40 = vpop.xlane.xlu1 %67 }
 0x113   :  { %v74_v42 = vsel %vm26_vm0, %v68_v40, 0.0 }
 0x11a   :  { %v73_v41 = vpop.xlane.xlu1 %72 }
 0x11b   :  { %v75_v43 = vsel %vm26_vm0, %v73_v41, 0.0 }
 0x11c   :  { %v76_v44 = vadd.f32 %v75_v43, %v74_v42 }
 0x11e   :  { %v77_v45 = vmul.f32 0.001953125, %v76_v44 }
 0x120   :  { %v78_v46 = vadd.f32 1e-05, %v77_v45 }
 0x122   :  { %160 = vrsqrt.f32 %v78_v46  ;;  %vm85_vm2 = vweird.f32 %v78_v46 }
 0x128   :  { %v161_v47 = vpop.eup %160 }
 0x129   :  { %v80_v48 = vmul.f32 %v161_v47, %v78_v46  ;;  %vm86_vm1 = vweird.f32 %v161_v47 }
 0x12a   :  { %vm87_vm3 = vmor %vm85_vm2, %vm86_vm1 }
 0x12b   :  { %v81_v49 = vmul.f32 %v161_v47, %v80_v48 }
 0x12d   :  { %v82_v50 = vmul.f32 0.5, %v81_v49 }
 0x12f   :  { %v83_v51 = vsub.f32 1.5, %v82_v50 }
 0x131   :  { %v84_v52 = vmul.f32 %v161_v47, %v83_v51 }
 0x132   :  { %v132_v2 = vpop.permute.xlu1 %131 }
 0x133   :  { %v88_v53 = vsel %vm87_vm3, %v161_v47, %v84_v52 }
 0x134   :  { %v95_v54 = vperm.slane %v88_v53, %v44_v20 }
 0x136   :  { %v97_v55 = vmul.f32 %v95_v54, %v47_v24  ;;  %v98_v56 = vmul.f32 %v95_v54, %v48_v25 }
 0x138   :  { %111 = vst [vmem:[#allocation1] ss:$2 sm:$0xff] %v97_v55 }
 0x139   :  { %115 = vst [vmem:[#allocation1 + $0x10] ss:$2 sm:$0xff] %v98_v56 }
 0x13f   :  { %v112_v58 = vld.sshfl [vmem:[#allocation1] sm:$0xff pattern:$0x75316420]  ;;  %v113_v59 = vld.sshfl [vmem:[#allocation1 + $0x8] sm:$0xff pattern:$0x75316420] }
 0x140   :  { %v122_v61 = vmul.f32 %v112_v58, %v102_v57  ;;  %v123_v62 = vmul.f32 %v113_v59, %v102_v57  ;;  %v116_v0 = vld.sshfl [vmem:[#allocation1 + $0x10] sm:$0xff pattern:$0x75316420]  ;;  %v117_v1 = vld.sshfl [vmem:[#allocation1 + $0x18] sm:$0xff pattern:$0x75316420] }
 0x141   :  { %v124_v3 = vmul.f32 %v116_v0, %v107_v63  ;;  %v125_v4 = vmul.f32 %v117_v1, %v107_v63 }
 0x142   :  { %v135_v5 = vadd.f32 %v128_v60, %v123_v62  ;;  %v134_v7 = vadd.f32 %v128_v60, %v122_v61 }
 0x143   :  { %v137_v6 = vadd.f32 %v132_v2, %v125_v4  ;;  %v136_v9 = vadd.f32 %v132_v2, %v124_v3 }
 0x144   :  { %v142_v8 = vrot.slane %v135_v5, 4 }
 0x145   :  { %v143_v10 = vrot.slane %v137_v6, 4 }
 0x146   :  { %v144_v11 = vsel %vm26_vm0, %v134_v7, %v142_v8 }
 0x147   :  { %v145_v12 = vsel %vm26_vm0, %v136_v9, %v143_v10  ;;  %148 = vst [vmem:[%s214_s2] sm:$0xff] %v144_v11 }
 0x148   :  { %149 = vst [vmem:[%s214_s2 + $0x8] sm:$0xff] %v145_v12 }

</bundles_post_ra>
